<compile_context>
chip_gen: v7x
topology: tpu7x:2x2x1
jax: 0.10.0
libtpu: 0.0.40
codegen_flags: <defaults>
</compile_context>

<pallas_src>
import jax
import jax.numpy as jnp
import numpy as np
from jax import lax
from jax.experimental import pallas as pl
from jax.experimental.pallas import tpu as pltpu

SUB = 64  # rows per in-kernel sub-chunk (keeps the (SUB,512) conv result small)


def _round_up(a, b):
    return (a + b - 1) // b * b


def net_kernel(x_ref, wconv_ref, bconv_ref, wfc_ref, bfc_ref, out_ref):
    # x_ref:     (TN, 36)   bf16 flattened 6x6 single-channel input tile
    # wconv_ref: (36, 512)  bf16 conv-as-matmul weights, col = win*128 + pool_pos*32 + c
    # bconv_ref: (1, 128)   f32 conv bias in pool_pos*32 + c order (applied post-pool)
    # wfc_ref:   (128, 128) bf16 fc weight (rows pool_pos*32 + c, cols padded K->128)
    # bfc_ref:   (1, 128)   f32 fc bias (padded)
    # out_ref:   (TN, 128)  bf16 padded fc output
    n_sub = x_ref.shape[0] // SUB  # static; TN is a multiple of SUB by construction

    for s in range(n_sub):  # static unroll; all slices below are static ref views
        r0 = s * SUB
        xs = x_ref[r0:r0 + SUB, :]                                     # (SUB, 36) bf16
        conv = jnp.dot(xs, wconv_ref[...],
                       preferred_element_type=jnp.float32)             # (SUB, 512) f32

        # MaxPool 2x2 stride 2: max over the four contiguous 128-lane window slices.
        pooled = jnp.maximum(jnp.maximum(conv[:, 0:128], conv[:, 128:256]),
                             jnp.maximum(conv[:, 256:384], conv[:, 384:512]))

        # Conv bias + ReLU after the pool (valid: monotone ReLU, per-channel bias).
        pooled = jnp.maximum(pooled + bconv_ref[...], 0.0).astype(jnp.bfloat16)

        y = jnp.dot(pooled, wfc_ref[...],
                    preferred_element_type=jnp.float32) + bfc_ref[...]
        out_ref[r0:r0 + SUB, :] = jnp.maximum(y, 0.0).astype(out_ref.dtype)


def _conv_as_matmul(w_conv):
    """Fold the 1->32 3x3 valid conv on a 6x6 input into a dense (36, 512) matrix.

    Column index = win*128 + pool_pos*32 + c, where pool_pos = ph*2 + pw is the
    2x2-maxpool output position and win = wh*2 + ww is the position inside the
    pool window; the conv output position is (oh, ow) = (2*ph + wh, 2*pw + ww).
    """
    w = np.asarray(w_conv, np.float32)             # (32, 1, 3, 3)
    mat = np.zeros((36, 512), np.float32)
    for ph in range(2):
        for pw in range(2):
            for wh in range(2):
                for ww in range(2):
                    oh, ow = 2 * ph + wh, 2 * pw + ww
                    col0 = (wh * 2 + ww) * 128 + (ph * 2 + pw) * 32
                    for kh in range(3):
                        for kw in range(3):
                            row = (oh + kh) * 6 + (ow + kw)
                            mat[row, col0:col0 + 32] = w[:, 0, kh, kw]
    return jnp.asarray(mat)


def net_forward(x_nchw, w_conv, b_conv, w_fc, b_fc, *, batch_tile=1024):
    """x_nchw: (N,1,6,6); w_conv: (32,1,3,3); b_conv: (32,);
       w_fc: (K,128) torch layout; b_fc: (K,). Returns (N,K) float32."""
    n = x_nchw.shape[0]
    k = w_fc.shape[0]
    assert x_nchw.shape[1:] == (1, 6, 6), x_nchw.shape
    assert w_fc.shape == (k, 128) and k <= 128

    # bf16 MXU operands (f32 accumulation happens inside the kernel).
    x_flat = x_nchw.reshape(n, 36).astype(jnp.bfloat16)
    wconv = _conv_as_matmul(w_conv).astype(jnp.bfloat16)                 # (36, 512)
    bconv = jnp.tile(jnp.asarray(b_conv, jnp.float32), 4).reshape(1, 128)

    # Torch flatten col index = c*4 + ph*2 + pw ; kernel row index = (ph*2+pw)*32 + c.
    wf = jnp.transpose(jnp.asarray(w_fc, jnp.float32).reshape(k, 32, 2, 2),
                       (2, 3, 1, 0)).reshape(128, k)
    wfc = (jnp.zeros((128, 128), jnp.float32).at[:, :k].set(wf)
           .astype(jnp.bfloat16))                                        # pad K -> 128
    bfc = jnp.zeros((1, 128), jnp.float32).at[0, :k].set(
        jnp.asarray(b_fc, jnp.float32))

    # Batch tile: multiple of SUB (=64); ensure >=2 grid steps whenever N > 64 so
    # both v7x TensorCores get work; pad N up to a multiple of the tile.
    batch_tile = max(SUB, (int(batch_tile) // SUB) * SUB)
    steps = max(1, -(-n // batch_tile))
    if steps == 1 and n > SUB:
        steps = 2
    tn = min(batch_tile, _round_up(-(-n // steps), SUB))
    assert tn % SUB == 0
    n_pad = _round_up(n, tn)
    if n_pad != n:
        x_flat = jnp.pad(x_flat, ((0, n_pad - n), (0, 0)))

    out = pl.pallas_call(
        net_kernel,
        out_shape=jax.ShapeDtypeStruct((n_pad, 128), jnp.bfloat16),
        grid=(n_pad // tn,),
        in_specs=[
            pl.BlockSpec((tn, 36), lambda i: (i, 0)),    # per-tile input (pipelined)
            pl.BlockSpec((36, 512), lambda i: (0, 0)),   # weights resident across steps
            pl.BlockSpec((1, 128), lambda i: (0, 0)),
            pl.BlockSpec((128, 128), lambda i: (0, 0)),
            pl.BlockSpec((1, 128), lambda i: (0, 0)),
        ],
        out_specs=pl.BlockSpec((tn, 128), lambda i: (i, 0)),
        compiler_params=pltpu.CompilerParams(
            dimension_semantics=("parallel",),
            vmem_limit_bytes=32 * 1024 * 1024,
        ),
    )(x_flat, wconv, bconv, wfc, bfc)

    return out[:n, :k].astype(jnp.float32)


def net_reference(x_nchw, w_conv, b_conv, w_fc, b_fc):
    """Pure-JAX mirror of the PyTorch forward (NCHW), with the same bf16 input
    quantization as the kernel so the comparison tolerance can stay tight."""
    f32 = jnp.float32
    bf = lambda a: jnp.asarray(a, jnp.bfloat16).astype(f32)
    x = bf(x_nchw)
    wc = bf(w_conv)
    wf = bf(w_fc)
    conv = lax.conv_general_dilated(
        x, wc, window_strides=(1, 1), padding="VALID",
        dimension_numbers=("NCHW", "OIHW", "NCHW"),
        precision=lax.Precision.HIGHEST)
    conv = jnp.maximum(conv + jnp.asarray(b_conv, f32).reshape(1, -1, 1, 1), 0.0)
    pooled = lax.reduce_window(conv, -jnp.inf, lax.max,
                               (1, 1, 2, 2), (1, 1, 2, 2), "VALID")
    flat = pooled.reshape(pooled.shape[0], -1)                          # torch .view order
    y = jnp.dot(flat, wf.T, precision=lax.Precision.HIGHEST) + jnp.asarray(b_fc, f32)
    return jnp.maximum(y, 0.0)


if __name__ == "__main__":
    num_classes = 10
    key = jax.random.PRNGKey(0)
    k1, k2, k3, k4, k5, k6 = jax.random.split(key, 6)

    # Deterministic synthetic parameters (shapes from Net.__init__).
    x = jax.random.normal(k1, (2, 1, 6, 6), jnp.float32)
    w_conv = jax.random.normal(k2, (32, 1, 3, 3), jnp.float32) * (1.0 / 3.0)
    b_conv = jax.random.normal(k3, (32,), jnp.float32) * 0.1
    w_fc = jax.random.normal(k4, (num_classes, 128), jnp.float32) * (128.0 ** -0.5)
    b_fc = jax.random.normal(k5, (num_classes,), jnp.float32) * 0.1

    out = jax.block_until_ready(net_forward(x, w_conv, b_conv, w_fc, b_fc))
    ref = net_reference(x, w_conv, b_conv, w_fc, b_fc)
    assert out.shape == (2, num_classes), out.shape
    assert jnp.allclose(out, ref, atol=2e-2, rtol=2e-2), (out, ref)

    # Second check: batch large enough to exercise the multi-tile (2-step) grid path.
    x2 = jax.random.normal(k6, (72, 1, 6, 6), jnp.float32)
    out2 = jax.block_until_ready(net_forward(x2, w_conv, b_conv, w_fc, b_fc))
    ref2 = net_reference(x2, w_conv, b_conv, w_fc, b_fc)
    assert out2.shape == (72, num_classes), out2.shape
    assert jnp.allclose(out2, ref2, atol=2e-2, rtol=2e-2), (out2, ref2)

    print("KERNEL_OK")
</pallas_src>

<mosaic_0001>
module attributes {stable_mosaic.version = 11 : i64} {
  func.func @net_kernel(%arg0: i32, %arg1: memref<64x36xbf16, #tpu.memory_space<vmem>>, %arg2: memref<36x512xbf16, #tpu.memory_space<vmem>>, %arg3: memref<1x128xf32, #tpu.memory_space<vmem>>, %arg4: memref<128x128xbf16, #tpu.memory_space<vmem>>, %arg5: memref<1x128xf32, #tpu.memory_space<vmem>>, %arg6: memref<64x128xbf16, #tpu.memory_space<vmem>>) attributes {dimension_semantics = [#tpu.dimension_semantics<parallel>], iteration_bounds = array<i64: 1>, scalar_prefetch = 0 : i64, scratch_operands = 0 : i64, tpu.core_type = #tpu.core_type<tc>, window_params = [{transform_indices = @transform_0, window_bounds = array<i64: 64, 36>}, {pipeline_mode = #tpu.pipeline_mode<synchronous>, transform_indices = @transform_1, window_bounds = array<i64: 36, 512>}, {pipeline_mode = #tpu.pipeline_mode<synchronous>, transform_indices = @transform_2, window_bounds = array<i64: 1, 128>}, {pipeline_mode = #tpu.pipeline_mode<synchronous>, transform_indices = @transform_3, window_bounds = array<i64: 128, 128>}, {pipeline_mode = #tpu.pipeline_mode<synchronous>, transform_indices = @transform_4, window_bounds = array<i64: 1, 128>}, {transform_indices = @transform_5, window_bounds = array<i64: 64, 128>}]} {
    %c0 = arith.constant 0 : index
    %c0_0 = arith.constant 0 : index
    %0 = vector.load %arg1[%c0, %c0_0] : memref<64x36xbf16, #tpu.memory_space<vmem>>, vector<64x36xbf16>
    %c0_1 = arith.constant 0 : index
    %c0_2 = arith.constant 0 : index
    %1 = vector.load %arg2[%c0_1, %c0_2] : memref<36x512xbf16, #tpu.memory_space<vmem>>, vector<36x512xbf16>
    %cst = arith.constant dense<0.000000e+00> : vector<64x512xf32>
    %2 = tpu.matmul %0, %1, %cst {dimension_numbers = #tpu.dot_dimension_numbers<[1], [0], [0], [1], [0, 0, 1, 1], [], []>} : vector<64x36xbf16>, vector<36x512xbf16>, vector<64x512xf32> -> vector<64x512xf32>
    %3 = vector.extract_strided_slice %2 {offsets = [0, 0], sizes = [64, 128], strides = [1, 1]} : vector<64x512xf32> to vector<64x128xf32>
    %4 = vector.extract_strided_slice %2 {offsets = [0, 128], sizes = [64, 128], strides = [1, 1]} : vector<64x512xf32> to vector<64x128xf32>
    %5 = arith.maximumf %3, %4 : vector<64x128xf32>
    %6 = vector.extract_strided_slice %2 {offsets = [0, 256], sizes = [64, 128], strides = [1, 1]} : vector<64x512xf32> to vector<64x128xf32>
    %7 = vector.extract_strided_slice %2 {offsets = [0, 384], sizes = [64, 128], strides = [1, 1]} : vector<64x512xf32> to vector<64x128xf32>
    %8 = arith.maximumf %6, %7 : vector<64x128xf32>
    %9 = arith.maximumf %5, %8 : vector<64x128xf32>
    %c0_3 = arith.constant 0 : index
    %c0_4 = arith.constant 0 : index
    %10 = vector.load %arg3[%c0_3, %c0_4] : memref<1x128xf32, #tpu.memory_space<vmem>>, vector<1x128xf32>
    %11 = vector.broadcast %10 : vector<1x128xf32> to vector<64x128xf32>
    %12 = arith.addf %9, %11 : vector<64x128xf32>
    %cst_5 = arith.constant 0.000000e+00 : f32
    %13 = vector.broadcast %cst_5 : f32 to vector<64x128xf32>
    %14 = arith.maximumf %12, %13 : vector<64x128xf32>
    %15 = arith.truncf %14 : vector<64x128xf32> to vector<64x128xbf16>
    %c0_6 = arith.constant 0 : index
    %c0_7 = arith.constant 0 : index
    %16 = vector.load %arg4[%c0_6, %c0_7] : memref<128x128xbf16, #tpu.memory_space<vmem>>, vector<128x128xbf16>
    %cst_8 = arith.constant dense<0.000000e+00> : vector<64x128xf32>
    %17 = tpu.matmul %15, %16, %cst_8 {dimension_numbers = #tpu.dot_dimension_numbers<[1], [0], [0], [1], [0, 0, 1, 1], [], []>} : vector<64x128xbf16>, vector<128x128xbf16>, vector<64x128xf32> -> vector<64x128xf32>
    %c0_9 = arith.constant 0 : index
    %c0_10 = arith.constant 0 : index
    %18 = vector.load %arg5[%c0_9, %c0_10] : memref<1x128xf32, #tpu.memory_space<vmem>>, vector<1x128xf32>
    %19 = vector.broadcast %18 : vector<1x128xf32> to vector<64x128xf32>
    %20 = arith.addf %17, %19 : vector<64x128xf32>
    %cst_11 = arith.constant 0.000000e+00 : f32
    %21 = vector.broadcast %cst_11 : f32 to vector<64x128xf32>
    %22 = arith.maximumf %20, %21 : vector<64x128xf32>
    %23 = arith.truncf %22 : vector<64x128xf32> to vector<64x128xbf16>
    %c0_12 = arith.constant 0 : index
    %c0_13 = arith.constant 0 : index
    %24 = vector.load %arg6[%c0_12, %c0_13] : memref<64x128xbf16, #tpu.memory_space<vmem>>, vector<64x128xbf16>
    tpu.vector_store %arg6[%c0_12, %c0_13], %23 {strides = array<i32>} : memref<64x128xbf16, #tpu.memory_space<vmem>>, vector<64x128xbf16>,
    return
  }
  func.func @transform_0(%arg0: i32) -> (i32, i32) {
    %c0_i32 = arith.constant 0 : i32
    %c0_i32_0 = arith.constant 0 : i32
    return %arg0, %c0_i32 : i32, i32
  }
  func.func @transform_1(%arg0: i32) -> (i32, i32) {
    %c0_i32 = arith.constant 0 : i32
    %c0_i32_0 = arith.constant 0 : i32
    %c0_i32_1 = arith.constant 0 : i32
    return %c0_i32, %c0_i32_0 : i32, i32
  }
  func.func @transform_2(%arg0: i32) -> (i32, i32) {
    %c0_i32 = arith.constant 0 : i32
    %c0_i32_0 = arith.constant 0 : i32
    %c0_i32_1 = arith.constant 0 : i32
    return %c0_i32, %c0_i32_0 : i32, i32
  }
  func.func @transform_3(%arg0: i32) -> (i32, i32) {
    %c0_i32 = arith.constant 0 : i32
    %c0_i32_0 = arith.constant 0 : i32
    %c0_i32_1 = arith.constant 0 : i32
    return %c0_i32, %c0_i32_0 : i32, i32
  }
  func.func @transform_4(%arg0: i32) -> (i32, i32) {
    %c0_i32 = arith.constant 0 : i32
    %c0_i32_0 = arith.constant 0 : i32
    %c0_i32_1 = arith.constant 0 : i32
    return %c0_i32, %c0_i32_0 : i32, i32
  }
  func.func @transform_5(%arg0: i32) -> (i32, i32) {
    %c0_i32 = arith.constant 0 : i32
    %c0_i32_0 = arith.constant 0 : i32
    return %arg0, %c0_i32 : i32, i32
  }
}

</mosaic_0001>

<bundles_post_ra>
// kernel: tpu_custom_call.1
= control target key start
LH: loop header
LB: loop body
LE: loop exit
PB: predicated region body
PF: predicated region fallthrough
CT: control target
= control target key end

     0   :  { %10 = vsyncpa [#allocation3], 0  ;;  %s914_s0 = inlined_call_operand.vmem [shape: bf16[64,36], index: 0, kind: input, shape index: {}]   ;;  %s915_s1 = inlined_call_operand.hbm [shape: bf16[36,512], index: 1, kind: input, shape index: {}]   ;;  %s916_s2 = inlined_call_operand.vmem [shape: f32[1,128], index: 2, kind: input, shape index: {}]   ;;  %s917_s3 = inlined_call_operand.hbm [shape: bf16[128,128], index: 3, kind: input, shape index: {}]   ;;  %s918_s4 = inlined_call_operand.vmem [shape: f32[1,128], index: 4, kind: input, shape index: {}]   ;;  %s919_s5 = inlined_call_operand.hbm [shape: bf16[64,128], index: 5, kind: output, shape index: {}]  }
   0x1   :  { %11 = vsyncpa [#allocation6], 0 }
   0x2   :  { %12 = vsyncpa [#allocation4], 0  ;;  %s798_s18 = smov [#allocation2]   ;;  %s726_s22 = scalar_lea.hbm %s915_s1, 1280 }
   0x3   :  { %s20_s19 = sshll.u32 %s798_s18, 4  ;;  %p727_p0 = scmp.ne.s32.totalorder %s915_s1, %s726_s22  ;;  %s21_s19 = int_to_ptr.vmem [resolvable:$true] %s20_s19 }
   0x4   :  { %p730_p1 = scmp.lt.u32.totalorder %s726_s22, %s915_s1 }
   0x6   :  { %p732_p2 = pnand %p730_p1, %p727_p0 }
   0x8   :  { %735 = shalt.err (!%p732_p2)
}
   0x9   :  { %s736_s27 = scalar_lea.vmem %s21_s19, 1280  ;;  %p741_p4 = scmp.lt.s32.totalorder %s21_s19, %s21_s19 }
   0xa   :  { %p737_p3 = scmp.ne.s32.totalorder %s21_s19, %s736_s27  ;;  %p742_p5 = scmp.lt.s32.totalorder %s736_s27, %s736_s27 }
   0xc   :  { %p743_p6 = por %p742_p5, %p741_p4 }
   0xe   :  { %p744_p7 = pnand %p743_p6, %p737_p3 }
  0x10   :  { %747 = shalt.err (!%p744_p7)
}
  0x11   :  { %s799_s28 = smov 256   ;;  %s800_s29 = smov 16  }
  0x12   :  { %26 = dma.hbm_to_vmem [thread:$0]  %s915_s1, 1280, %s21_s19, [#allocation3], %s799_s28, %s799_s28, %s800_s29  }
  0x13   :  { %s801_s7 = smov [#allocation5]   ;;  %s748_s11 = scalar_lea.hbm %s917_s3, 1024 }
  0x14   :  { %s34_s8 = sshll.u32 %s801_s7, 4  ;;  %p749_p8 = scmp.ne.s32.totalorder %s917_s3, %s748_s11  ;;  %s35_s8 = int_to_ptr.vmem [resolvable:$true] %s34_s8 }
  0x15   :  { %p752_p9 = scmp.lt.u32.totalorder %s748_s11, %s917_s3 }
  0x17   :  { %p754_p10 = pnand %p752_p9, %p749_p8 }
  0x19   :  { %757 = shalt.err (!%p754_p10)
}
  0x1a   :  { %s758_s16 = scalar_lea.vmem %s35_s8, 1024  ;;  %p763_p12 = scmp.lt.s32.totalorder %s35_s8, %s35_s8 }
  0x1b   :  { %p759_p11 = scmp.ne.s32.totalorder %s35_s8, %s758_s16  ;;  %p764_p13 = scmp.lt.s32.totalorder %s758_s16, %s758_s16 }
  0x1d   :  { %p765_p0 = por %p764_p13, %p763_p12 }
  0x1f   :  { %p766_p1 = pnand %p765_p0, %p759_p11 }
  0x21   :  { %769 = shalt.err (!%p766_p1)
}
  0x22   :  { %s802_s1 = smov 64   ;;  %s803_s17 = smov 4  }
  0x23   :  { %40 = dma.hbm_to_vmem [thread:$0]  %s917_s3, 1024, %s35_s8, [#allocation6], %s802_s1, %s802_s1, %s803_s17  }
  0x24   :  { %792 = dma.done.wait [#allocation3], 1280  }
  0x25   :  { %793 = vsyncadd [#allocation3], 4294966016 }
  0x26   :  { %794 = dma.done.wait [#allocation6], 1024  }
  0x27   :  { %795 = vsyncadd [#allocation6], 4294966272  ;;  %v804_v0 = vmov 0   ;;  %v698_v1 = vld [vmem:[#allocation2 + $0x4] ss:$16 sps:$4 sm:$0xff]   ;;  %vm151_vm0 = vcmask 1041408  }
  0x28   :  { %196 = vmatprep.mubr.bf16.mxu0 %v804_v0  ;;  %269 = vmatprep.mubr.bf16.mxu1 %v804_v0  ;;  %v700_v2 = vld [vmem:[#allocation2 + $0xc] ss:$16 sps:$4 sm:$0xff]   ;;  %v702_v3 = vld [vmem:[#allocation2] ss:$16 sps:$4 sm:$0xff]   ;;  %v703_v4 = vld [vmem:[#allocation2 + $0x8] ss:$16 sps:$4 sm:$0xff]  }
  0x29   :  { %164 = vmatprep.subr.bf16.mxu0 %v698_v1  ;;  %237 = vmatprep.subr.bf16.mxu1 %v700_v2  ;;  %v704_v5 = vld [vmem:[#allocation2 + $0x24] ss:$16 sps:$4 sm:$0xff]   ;;  %v706_v6 = vld [vmem:[#allocation2 + $0x2c] ss:$16 sps:$4 sm:$0xff]   ;;  %v708_v7 = vld [vmem:[#allocation2 + $0x20] ss:$16 sps:$4 sm:$0xff]  }
  0x2a   :  { %165 = vmatpush1.bf16.msra.mxu0 %v702_v3  ;;  %238 = vmatpush1.bf16.msra.mxu1 %v703_v4  ;;  %v709_v8 = vld [vmem:[#allocation2 + $0x28] ss:$16 sps:$4 sm:$0xff]   ;;  %v66_v9 = vld [vmem:[#allocation2 + $0x40] sm:$0x33]  ;;  %v718_v18 = vld [vmem:[#allocation5] sm:$0xff]   ;;  %vm138_vm1 = vcmask 293888  }
  0x2b   :  { %166 = vmatprep.subr.bf16.mxu0 %v704_v5  ;;  %v67_v10 = vld [vmem:[#allocation2 + $0x48] sm:$0x33]  ;;  %239 = vmatprep.subr.bf16.mxu1 %v706_v6  ;;  %v576_v11 = vcombine.high %v66_v9, %v66_v9  ;;  %v575_v13 = vcombine.low %v66_v9, %v66_v9  ;;  %v714_v17 = vld [vmem:[%s914_s0] sm:$0xff]   ;;  %v719_v19 = vld [vmem:[#allocation5 + $0x8] sm:$0xff]  }
  0x2c   :  { %v578_v12 = vcombine.high %v67_v10, %v67_v10  ;;  %v577_v14 = vcombine.low %v67_v10, %v67_v10  ;;  %v720_v20 = vld [vmem:[#allocation5 + $0x10] sm:$0xff]   ;;  %v715_v21 = vld [vmem:[%s914_s0 + $0x8] sm:$0xff]   ;;  %v716_v22 = vld [vmem:[%s914_s0 + $0x10] sm:$0xff]  }
  0x2d   :  { %v153_v15 = vsel %vm151_vm0, %v575_v13, 0  ;;  %v717_v23 = vld [vmem:[%s914_s0 + $0x18] sm:$0xff]   ;;  %v721_v24 = vld [vmem:[#allocation5 + $0x18] sm:$0xff]   ;;  %v722_v25 = vld [vmem:[#allocation5 + $0x20] sm:$0xff]  }
  0x2e   :  { %167 = vmatpush1.bf16.msra.mxu0 %v708_v7  ;;  %240 = vmatpush1.bf16.msra.mxu1 %v709_v8  ;;  %v159_v16 = vsel %vm151_vm0, %v577_v14, 0  ;;  %v723_v26 = vld [vmem:[#allocation5 + $0x28] sm:$0xff]   ;;  %v724_v27 = vld [vmem:[#allocation5 + $0x30] sm:$0xff]   ;;  %v725_v28 = vld [vmem:[#allocation5 + $0x38] sm:$0xff]  }
  0x2f   :  { %579 = vmatprep.subr.msk.bf16.mxu0 %vm151_vm0, %v576_v11  ;;  %584 = vmatprep.subr.msk.bf16.mxu1 %vm151_vm0, %v578_v12  ;;  %v886_v37 = vld [vmem:[%s916_s2] ss:$0 sm:$0xff] }
  0x32   :  { %169 = vmatpush1.bf16.msra.mxu0 %v153_v15  ;;  %242 = vmatpush1.bf16.msra.mxu1 %v159_v16 }
  0x33   :  { %650 = vmatprep.subr.bf16.mxu0 %v718_v18  ;;  %674 = vmatprep.subr.bf16.mxu1 %v718_v18 }
  0x35   :  { %580 = vmatmul.mubr.msk.bf16.vlgmr.msra.gmra.mrb[0].mxu0 %vm138_vm1, %v714_v17  ;;  %585 = vmatmul.mubr.msk.bf16.vlgmr.msra.gmra.mrb[0].mxu1 %vm138_vm1, %v714_v17 }
  0x36   :  { %206 = vmatprep.mubr.bf16.mxu0 %v804_v0  ;;  %279 = vmatprep.mubr.bf16.mxu1 %v804_v0 }
  0x37   :  { %651 = vmatpush3.bf16.msra.mxu0 %v718_v18  ;;  %682 = vmatpush3.bf16.msra.mxu1 %v718_v18 }
  0x38   :  { %652 = vmatprep.subr.bf16.mxu0 %v719_v19  ;;  %675 = vmatprep.subr.bf16.mxu1 %v719_v19 }
  0x3b   :  { %653 = vmatpush3.bf16.msra.mxu0 %v719_v19  ;;  %683 = vmatpush3.bf16.msra.mxu1 %v719_v19 }
  0x3c   :  { %654 = vmatprep.subr.bf16.mxu0 %v720_v20  ;;  %676 = vmatprep.subr.bf16.mxu1 %v720_v20 }
  0x3d   :  { %581 = vmatmul.mubr.msk.bf16.gmra.mrb[4].mxu0 %vm138_vm1, %v715_v21  ;;  %586 = vmatmul.mubr.msk.bf16.gmra.mrb[4].mxu1 %vm138_vm1, %v715_v21 }
  0x3e   :  { %216 = vmatprep.mubr.bf16.mxu0 %v804_v0  ;;  %289 = vmatprep.mubr.bf16.mxu1 %v804_v0 }
  0x3f   :  { %655 = vmatpush3.bf16.msra.mxu0 %v720_v20  ;;  %684 = vmatpush3.bf16.msra.mxu1 %v720_v20 }
  0x40   :  { %656 = vmatprep.subr.bf16.mxu0 %v721_v24  ;;  %677 = vmatprep.subr.bf16.mxu1 %v721_v24 }
  0x43   :  { %657 = vmatpush3.bf16.msra.mxu0 %v721_v24  ;;  %685 = vmatpush3.bf16.msra.mxu1 %v721_v24 }
  0x44   :  { %658 = vmatprep.subr.bf16.mxu0 %v722_v25  ;;  %678 = vmatprep.subr.bf16.mxu1 %v722_v25 }
  0x45   :  { %582 = vmatmul.mubr.msk.bf16.gmra.mrb[8].mxu0 %vm138_vm1, %v716_v22  ;;  %587 = vmatmul.mubr.msk.bf16.gmra.mrb[8].mxu1 %vm138_vm1, %v716_v22 }
  0x46   :  { %226 = vmatprep.mubr.bf16.mxu0 %v804_v0  ;;  %299 = vmatprep.mubr.bf16.mxu1 %v804_v0 }
  0x47   :  { %659 = vmatpush3.bf16.msra.mxu0 %v722_v25  ;;  %686 = vmatpush3.bf16.msra.mxu1 %v722_v25 }
  0x48   :  { %660 = vmatprep.subr.bf16.mxu0 %v723_v26  ;;  %679 = vmatprep.subr.bf16.mxu1 %v723_v26 }
  0x4b   :  { %661 = vmatpush3.bf16.msra.mxu0 %v723_v26  ;;  %687 = vmatpush3.bf16.msra.mxu1 %v723_v26 }
  0x4c   :  { %662 = vmatprep.subr.bf16.mxu0 %v724_v27  ;;  %680 = vmatprep.subr.bf16.mxu1 %v724_v27 }
  0x4d   :  { %583 = vmatmul.mubr.msk.bf16.gmra.mrb[12].mxu0 %vm138_vm1, %v717_v23  ;;  %588 = vmatmul.mubr.msk.bf16.gmra.mrb[12].mxu1 %vm138_vm1, %v717_v23 }
  0x4f   :  { %663 = vmatpush3.bf16.msra.mxu0 %v724_v27  ;;  %688 = vmatpush3.bf16.msra.mxu1 %v724_v27 }
  0x50   :  { %664 = vmatprep.subr.bf16.mxu0 %v725_v28  ;;  %681 = vmatprep.subr.bf16.mxu1 %v725_v28 }
  0x53   :  { %665 = vmatpush3.bf16.msra.mxu0 %v725_v28  ;;  %689 = vmatpush3.bf16.msra.mxu1 %v725_v28 }
 0x108   :  { %v198_v29 = vpop.f32.mrb[0].mxu0  ;;  %v271_v30 = vpop.f32.mrb[0].mxu1 }
 0x109   :  { %v200_v31 = vpop.f32.mrb[1].mxu0  ;;  %v273_v32 = vpop.f32.mrb[1].mxu1 }
 0x10a   :  { %v310_v33 = vmax.f32 %v198_v29, %v200_v31  ;;  %v318_v34 = vmax.f32 %v271_v30, %v273_v32  ;;  %v202_v35 = vpop.f32.mrb[2].mxu0  ;;  %v275_v36 = vpop.f32.mrb[2].mxu1 }
 0x10b   :  { %v204_v38 = vpop.f32.mrb[3].mxu0  ;;  %v277_v39 = vpop.f32.mrb[3].mxu1 }
 0x10c   :  { %v326_v40 = vmax.f32 %v310_v33, %v318_v34  ;;  %v311_v41 = vmax.f32 %v202_v35, %v204_v38  ;;  %v319_v42 = vmax.f32 %v275_v36, %v277_v39 }
 0x10e   :  { %v341_v43 = vadd.f32 %v886_v37, %v326_v40  ;;  %v327_v44 = vmax.f32 %v311_v41, %v319_v42 }
 0x110   :  { %v342_v45 = vadd.f32 %v886_v37, %v327_v44  ;;  %v208_v46 = vpop.f32.mrb[4].mxu0  ;;  %v281_v47 = vpop.f32.mrb[4].mxu1  ;;  %v349_v50 = vmax.f32 %v341_v43, 0.0  ;;  %v590_v43 = vld [vmem:[%s918_s4] ss:$0 sm:$0xff]  ;;  %s805_s4 = smov [#allocation7]  }
 0x111   :  { %v210_v48 = vpop.f32.mrb[5].mxu0  ;;  %v283_v49 = vpop.f32.mrb[5].mxu1  ;;  %s550_s29 = sshll.u32 %s805_s4, 4  ;;  %s551_s29 = int_to_ptr.vmem [resolvable:$true] %s550_s29 }
 0x112   :  { %v350_v51 = vmax.f32 %v342_v45, 0.0  ;;  %v312_v52 = vmax.f32 %v208_v46, %v210_v48  ;;  %v320_v53 = vmax.f32 %v281_v47, %v283_v49  ;;  %v212_v54 = vpop.f32.mrb[6].mxu0  ;;  %v285_v55 = vpop.f32.mrb[6].mxu1  ;;  %s770_s30 = scalar_lea.vmem %s551_s29, 512  ;;  %p775_p3 = scmp.lt.s32.totalorder %s551_s29, %s551_s29 }
 0x113   :  { %v214_v56 = vpop.f32.mrb[7].mxu0  ;;  %v287_v57 = vpop.f32.mrb[7].mxu1  ;;  %p771_p2 = scmp.ne.s32.totalorder %s551_s29, %s770_s30  ;;  %p776_p4 = scmp.lt.s32.totalorder %s770_s30, %s770_s30 }
 0x114   :  { %v328_v58 = vmax.f32 %v312_v52, %v320_v53  ;;  %v313_v59 = vmax.f32 %v212_v54, %v214_v56  ;;  %v321_v60 = vmax.f32 %v285_v55, %v287_v57  ;;  %v357_v61 = vpack.c.bf16 %v350_v51, %v349_v50 }
 0x115   :  { %p777_p5 = por %p776_p4, %p775_p3 }
 0x116   :  { %v343_v62 = vadd.f32 %v886_v37, %v328_v58  ;;  %v329_v63 = vmax.f32 %v313_v59, %v321_v60  ;;  %666 = vmatprep.mubr.bf16.mxu0 %v357_v61 }
 0x117   :  { %p778_p6 = pnand %p777_p5, %p771_p2 }
 0x118   :  { %v344_v0 = vadd.f32 %v886_v37, %v329_v63  ;;  %v218_v1 = vpop.f32.mrb[8].mxu0  ;;  %v291_v2 = vpop.f32.mrb[8].mxu1  ;;  %v351_v5 = vmax.f32 %v343_v62, 0.0 }
 0x119   :  { %v220_v3 = vpop.f32.mrb[9].mxu0  ;;  %v293_v4 = vpop.f32.mrb[9].mxu1 }
 0x11a   :  { %v352_v6 = vmax.f32 %v344_v0, 0.0  ;;  %v314_v7 = vmax.f32 %v218_v1, %v220_v3  ;;  %v322_v8 = vmax.f32 %v291_v2, %v293_v4  ;;  %v222_v9 = vpop.f32.mrb[10].mxu0  ;;  %v295_v10 = vpop.f32.mrb[10].mxu1 }
 0x11b   :  { %v224_v11 = vpop.f32.mrb[11].mxu0  ;;  %v297_v12 = vpop.f32.mrb[11].mxu1 }
 0x11c   :  { %v358_v13 = vpack.c.bf16 %v352_v6, %v351_v5  ;;  %v330_v14 = vmax.f32 %v314_v7, %v322_v8  ;;  %v315_v15 = vmax.f32 %v222_v9, %v224_v11  ;;  %v323_v16 = vmax.f32 %v295_v10, %v297_v12 }
 0x11e   :  { %v345_v17 = vadd.f32 %v886_v37, %v330_v14  ;;  %v331_v18 = vmax.f32 %v315_v15, %v323_v16  ;;  %667 = vmatmul.mubr.bf16.vlgmr.msra.gmra.mrb[16].mxu0 %v358_v13 }
 0x120   :  { %v346_v19 = vadd.f32 %v886_v37, %v331_v18  ;;  %v228_v20 = vpop.f32.mrb[12].mxu0  ;;  %v301_v21 = vpop.f32.mrb[12].mxu1  ;;  %v353_v24 = vmax.f32 %v345_v17, 0.0 }
 0x121   :  { %v230_v22 = vpop.f32.mrb[13].mxu0  ;;  %v303_v23 = vpop.f32.mrb[13].mxu1 }
 0x122   :  { %v354_v25 = vmax.f32 %v346_v19, 0.0  ;;  %v316_v26 = vmax.f32 %v228_v20, %v230_v22  ;;  %v324_v27 = vmax.f32 %v301_v21, %v303_v23  ;;  %v232_v28 = vpop.f32.mrb[14].mxu0  ;;  %v305_v29 = vpop.f32.mrb[14].mxu1 }
 0x123   :  { %v234_v30 = vpop.f32.mrb[15].mxu0  ;;  %v307_v31 = vpop.f32.mrb[15].mxu1 }
 0x124   :  { %v332_v32 = vmax.f32 %v316_v26, %v324_v27  ;;  %v317_v33 = vmax.f32 %v232_v28, %v234_v30  ;;  %v325_v34 = vmax.f32 %v305_v29, %v307_v31  ;;  %v359_v35 = vpack.c.bf16 %v354_v25, %v353_v24 }
 0x126   :  { %v347_v36 = vadd.f32 %v886_v37, %v332_v32  ;;  %v333_v38 = vmax.f32 %v317_v33, %v325_v34  ;;  %670 = vmatprep.mubr.bf16.mxu1 %v359_v35 }
 0x128   :  { %v348_v39 = vadd.f32 %v886_v37, %v333_v38  ;;  %v355_v40 = vmax.f32 %v347_v36, 0.0 }
 0x12a   :  { %v356_v41 = vmax.f32 %v348_v39, 0.0 }
 0x12c   :  { %v360_v42 = vpack.c.bf16 %v356_v41, %v355_v40 }
 0x12e   :  { %671 = vmatmul.mubr.bf16.vlgmr.msra.gmra.mrb[16].mxu1 %v360_v42 }
 0x1f1   :  { %v668_v44 = vpop.f32.mrb[16].mxu0 }
 0x1f2   :  { %v475_v45 = vadd.f32 %v668_v44, %v590_v43  ;;  %v466_v46 = vpop.f32.mrb[17].mxu0 }
 0x1f3   :  { %v467_v47 = vadd.f32 %v590_v43, %v466_v46  ;;  %v669_v48 = vpop.f32.mrb[18].mxu0 }
 0x1f4   :  { %v478_v49 = vadd.f32 %v669_v48, %v590_v43  ;;  %v469_v50 = vpop.f32.mrb[19].mxu0  ;;  %v499_v52 = vmax.f32 %v475_v45, 0.0 }
 0x1f5   :  { %v470_v51 = vadd.f32 %v590_v43, %v469_v50  ;;  %v497_v54 = vmax.f32 %v467_v47, 0.0 }
 0x1f6   :  { %v500_v53 = vmax.f32 %v478_v49, 0.0 }
 0x1f7   :  { %v498_v37 = vmax.f32 %v470_v51, 0.0 }
 0x1f8   :  { %v623_v55 = vpack.c.bf16 %v500_v53, %v499_v52 }
 0x1f9   :  { %v618_v56 = vpack.c.bf16 %v498_v37, %v497_v54 }
 0x1fa   :  { %635 = vst [vmem:[#allocation7 + $0x8] sm:$0xff] %v623_v55  }
 0x1fb   :  { %619 = vst [vmem:[#allocation7] sm:$0xff] %v618_v56  }
 0x201   :  { %v672_v57 = vpop.f32.mrb[16].mxu1 }
 0x202   :  { %v491_v58 = vadd.f32 %v672_v57, %v590_v43  ;;  %v482_v59 = vpop.f32.mrb[17].mxu1 }
 0x203   :  { %v483_v60 = vadd.f32 %v590_v43, %v482_v59  ;;  %v673_v61 = vpop.f32.mrb[18].mxu1 }
 0x204   :  { %v494_v62 = vadd.f32 %v673_v61, %v590_v43  ;;  %v485_v63 = vpop.f32.mrb[19].mxu1  ;;  %v503_v1 = vmax.f32 %v491_v58, 0.0 }
 0x205   :  { %v486_v0 = vadd.f32 %v590_v43, %v485_v63  ;;  %v501_v3 = vmax.f32 %v483_v60, 0.0 }
 0x206   :  { %v504_v2 = vmax.f32 %v494_v62, 0.0 }
 0x207   :  { %v502_v4 = vmax.f32 %v486_v0, 0.0 }
 0x208   :  { %v633_v5 = vpack.c.bf16 %v504_v2, %v503_v1 }
 0x209   :  { %v628_v6 = vpack.c.bf16 %v502_v4, %v501_v3 }
 0x20a   :  { %637 = vst [vmem:[#allocation7 + $0x18] sm:$0xff] %v633_v5  }
 0x20b   :  { %636 = vst [vmem:[#allocation7 + $0x10] sm:$0xff] %v628_v6  }
 0x20c   :  { %781 = shalt.err (!%p778_p6)
}
 0x20d   :  { %s782_s8 = scalar_lea.hbm %s919_s5, 512 }
 0x20e   :  { %p783_p7 = scmp.ne.s32.totalorder %s919_s5, %s782_s8  ;;  %p786_p8 = scmp.lt.u32.totalorder %s782_s8, %s919_s5 }
 0x210   :  { %p788_p9 = pnand %p786_p8, %p783_p7 }
 0x212   :  { %791 = shalt.err (!%p788_p9)
}
 0x213   :  { %556 = dma.vmem_to_hbm [thread:$0]  %s551_s29, 512, %s919_s5, [#allocation4], %s802_s1, %s802_s1, %s803_s17  }
 0x214   :  { %796 = dma.done.wait [#allocation4], 512  }
 0x215   :  { %797 = vsyncadd [#allocation4], 4294966784 }
 0x216   :  { %560 = vsyncpa [#allocation3], 1 }
 0x217   :  { %561 = vsyncpa [#allocation6], 1 }
 0x218   :  { %562 = vsyncpa [#allocation4], 1 }

</bundles_post_ra>
